<compile_context>
chip_gen: v6e
topology: v6e:2x2x1
jax: 0.10.0
libtpu: 0.0.40
codegen_flags: <defaults>
</compile_context>

<pallas_src>
import jax
import jax.numpy as jnp
import numpy as np
from jax.experimental import pallas as pl
from jax.experimental.pallas import tpu as pltpu

N_FEAT = 2     # input features (fc1 in_features)
N_COMP = 3     # GMM components == fc1 out_features (required for the `+` in forward)
N_HID = 3      # fc1 out_features
N_OUT = 1      # fc2 out_features

CHUNK_R = 8    # rows per in-kernel chunk (one sublane group)

# Packed-parameter layout (28 f32 scalars in SMEM):
#   [0:6)   a[k,d]  = -0.5 / var[k,d]              (k-major)
#   [6:12)  b[k,d]  = mu[k,d] / var[k,d]           (k-major)
#   [12:15) c[k]    = log w_k - 0.5*sum_d mu^2/var - 0.5*sum_d log(2*pi*var)
#   [15:21) w1[j,d]                                 (j-major, PyTorch (out,in))
#   [21:24) b1[j]
#   [24:27) 0.5 * w2[0,j]      (pre-scaled for the tanh-sigmoid identity)
#   [27]    0.5 * b2[0]


def _round_up(v, m):
    return ((v + m - 1) // m) * m


def _prob_nn_kernel(p_ref, x0_ref, x1_ref, o_ref):
    """x0_ref/x1_ref: (TILE_R, LANES) feature planes; o_ref: (TILE_R, LANES)."""
    p = p_ref  # SMEM f32[28] -> cheap scalar reads (loop-invariant, hoisted)

    # GMM quadratic coefficients.
    a00, a01, a10, a11, a20, a21 = p[0], p[1], p[2], p[3], p[4], p[5]
    b00, b01, b10, b11, b20, b21 = p[6], p[7], p[8], p[9], p[10], p[11]
    c0, c1, c2 = p[12], p[13], p[14]
    # fc1 weights/bias.
    w100, w101, w110, w111, w120, w121 = p[15], p[16], p[17], p[18], p[19], p[20]
    bb0, bb1, bb2 = p[21], p[22], p[23]
    # fc2 weights/bias, pre-scaled by 0.5 on the host.
    v0, v1, v2, vb = p[24], p[25], p[26], p[27]

    tile_r = o_ref.shape[0]
    num_chunks = tile_r // CHUNK_R  # tile_r is a multiple of CHUNK_R by construction

    # Chunk the elementwise math over (CHUNK_R, LANES) sub-tiles so the live
    # vreg set stays well under the 64-vreg file (no spills).
    @pl.loop(0, num_chunks)
    def _(c):
        r = pl.multiple_of(c * CHUNK_R, CHUNK_R)
        x0 = x0_ref[pl.ds(r, CHUNK_R), :]
        x1 = x1_ref[pl.ds(r, CHUNK_R), :]
        x0sq = x0 * x0
        x1sq = x1 * x1

        # --- GMM per-component log-densities (diagonal covariance) ---------
        lp0 = a00 * x0sq + a01 * x1sq + b00 * x0 + b01 * x1 + c0
        lp1 = a10 * x0sq + a11 * x1sq + b10 * x0 + b11 * x1 + c1
        lp2 = a20 * x0sq + a21 * x1sq + b20 * x0 + b21 * x1 + c2

        # --- softmax over the 3 components (no lane reduction; VPU + EUP) --
        m = jnp.maximum(jnp.maximum(lp0, lp1), lp2)
        e0 = jnp.exp(lp0 - m)
        e1 = jnp.exp(lp1 - m)
        e2 = jnp.exp(lp2 - m)
        inv = pl.reciprocal(e0 + e1 + e2, approx=True)   # EUP slot

        # --- fc1 + ReLU (depth-2 contraction as broadcast FMAs) ------------
        h0 = jnp.maximum(w100 * x0 + w101 * x1 + bb0, 0.0)
        h1 = jnp.maximum(w110 * x0 + w111 * x1 + bb1, 0.0)
        h2 = jnp.maximum(w120 * x0 + w121 * x1 + bb2, 0.0)

        # --- (h + gmm_probs) -> fc2 -> sigmoid (via tanh on the EUP) -------
        z = (v0 * (h0 + e0 * inv) + v1 * (h1 + e1 * inv)
             + v2 * (h2 + e2 * inv) + vb)                # z == 0.5 * logits
        o_ref[pl.ds(r, CHUNK_R), :] = 0.5 * jnp.tanh(z) + 0.5


def probabilistic_nn_forward(x, gmm_weights, gmm_means, gmm_vars,
                             w1, b1, w2, b2, *, lanes=256, tile_rows=1024):
    """x: (N, 2) f32. Returns (N, 1) f32."""
    n = x.shape[0]

    # Lane width: multiple of 128; shrink for tiny batches to bound padding.
    lanes = int(max(128, min(lanes, _round_up(max(n, 1), 128))))
    n_rows = _round_up(pl.cdiv(n, lanes), CHUNK_R)           # multiple of 8
    tile_rows = int(_round_up(min(tile_rows, n_rows), CHUNK_R))
    n_rows_pad = _round_up(n_rows, tile_rows)
    num_tiles = n_rows_pad // tile_rows
    n_pad = n_rows_pad * lanes

    # Feature-major relayout; pad only the tail.  Padded lanes are zero and
    # produce finite garbage that is sliced away below.
    # TODO(synk): if the caller can supply x already feature-major (2, N), this
    # transpose copy disappears and the kernel hits the 12 B/elem HBM floor.
    xt = x.astype(jnp.float32).T                              # (2, N)
    if n_pad != n:
        xt = jnp.pad(xt, ((0, 0), (0, n_pad - n)))
    x0h = xt[0].reshape(n_rows_pad, lanes)
    x1h = xt[1].reshape(n_rows_pad, lanes)

    # Fold the diagonal-Gaussian log-density + linear layers into 28 scalars
    # (host-side scalar math; fc2 pre-scaled by 0.5 for the tanh identity).
    inv_var = 1.0 / gmm_vars                                          # (K, D)
    a = (-0.5 * inv_var).reshape(-1)                                  # (6,)
    b = (gmm_means * inv_var).reshape(-1)                             # (6,)
    c = (jnp.log(gmm_weights)
         - 0.5 * jnp.sum(gmm_means ** 2 * inv_var, axis=-1)
         - 0.5 * jnp.sum(jnp.log(2.0 * jnp.pi * gmm_vars), axis=-1))  # (3,)
    params = jnp.concatenate(
        [a, b, c,
         w1.reshape(-1), b1.reshape(-1),
         0.5 * w2.reshape(-1), 0.5 * b2.reshape(-1)]).astype(jnp.float32)  # (28,)

    out = pl.pallas_call(
        _prob_nn_kernel,
        out_shape=jax.ShapeDtypeStruct((n_rows_pad, lanes), jnp.float32),
        grid=(num_tiles,),
        in_specs=[
            pl.BlockSpec(memory_space=pltpu.MemorySpace.SMEM),        # params
            pl.BlockSpec((tile_rows, lanes), lambda i: (i, 0)),       # x feature 0
            pl.BlockSpec((tile_rows, lanes), lambda i: (i, 0)),       # x feature 1
        ],
        out_specs=pl.BlockSpec((tile_rows, lanes), lambda i: (i, 0)), # lane-dense
        compiler_params=pltpu.CompilerParams(
            dimension_semantics=("parallel",),
            vmem_limit_bytes=32 * 1024 * 1024),
    )(params, x0h, x1h)

    return out.reshape(-1)[:n].reshape(n, N_OUT)


def _reference_forward(x, gmm_weights, gmm_means, gmm_vars, w1, b1, w2, b2):
    """Pure-JAX reference mirroring the PyTorch forward (for a sanity check)."""
    x = x.astype(jnp.float32)
    inv_var = 1.0 / gmm_vars
    logp = (jnp.log(gmm_weights)[None, :]
            - 0.5 * jnp.sum(jnp.log(2.0 * jnp.pi * gmm_vars), axis=-1)[None, :]
            - 0.5 * jnp.sum((x[:, None, :] - gmm_means[None, :, :]) ** 2
                            * inv_var[None, :, :], axis=-1))
    resp = jax.nn.softmax(logp, axis=-1)
    h = jax.nn.relu(x @ w1.T + b1)
    return jax.nn.sigmoid((h + resp) @ w2.T + b2)


if __name__ == "__main__":
    key = jax.random.PRNGKey(0)
    k_x, k_mu, k_var, k_w, k_w1, k_b1, k_w2, k_b2 = jax.random.split(key, 8)

    batch = 8
    x = jax.random.normal(k_x, (batch, N_FEAT), dtype=jnp.float32)

    # Deterministic synthetic GMM (3 components, 2-D, diagonal covariance).
    gmm_means = jax.random.normal(k_mu, (N_COMP, N_FEAT), dtype=jnp.float32) * 2.0
    gmm_vars = jax.nn.softplus(jax.random.normal(k_var, (N_COMP, N_FEAT))) + 0.1
    gmm_weights = jax.nn.softmax(jax.random.normal(k_w, (N_COMP,)))

    # Deterministic synthetic fc1 / fc2 parameters (PyTorch Linear shapes).
    w1 = jax.random.normal(k_w1, (N_HID, N_FEAT), dtype=jnp.float32) * 0.5
    b1 = jax.random.normal(k_b1, (N_HID,), dtype=jnp.float32) * 0.1
    w2 = jax.random.normal(k_w2, (N_OUT, N_HID), dtype=jnp.float32) * 0.5
    b2 = jax.random.normal(k_b2, (N_OUT,), dtype=jnp.float32) * 0.1

    out = probabilistic_nn_forward(x, gmm_weights, gmm_means, gmm_vars,
                                   w1, b1, w2, b2)
    out = jax.block_until_ready(out)

    ref = _reference_forward(x, gmm_weights, gmm_means, gmm_vars, w1, b1, w2, b2)
    # Tolerance relaxed vs. exact fp32 because the softmax denominator uses the
    # EUP approximate reciprocal (relative error ~1e-4 after propagation).
    np.testing.assert_allclose(np.asarray(out), np.asarray(ref),
                               rtol=2e-3, atol=2e-3)

    assert out.shape == (batch, N_OUT)
    print("KERNEL_OK")
</pallas_src>

<mosaic_0001>
module attributes {stable_mosaic.version = 11 : i64} {
  func.func @_prob_nn_kernel(%arg0: i32, %arg1: memref<28xf32, #tpu.memory_space<smem>>, %arg2: memref<8x128xf32, #tpu.memory_space<vmem>>, %arg3: memref<8x128xf32, #tpu.memory_space<vmem>>, %arg4: memref<8x128xf32, #tpu.memory_space<vmem>>) attributes {dimension_semantics = [#tpu.dimension_semantics<parallel>], iteration_bounds = array<i64: 1>, scalar_prefetch = 0 : i64, scratch_operands = 0 : i64, tpu.core_type = #tpu.core_type<tc>, window_params = [{transform_indices = @transform_0, window_bounds = array<i64: 28>}, {transform_indices = @transform_1, window_bounds = array<i64: 8, 128>}, {transform_indices = @transform_2, window_bounds = array<i64: 8, 128>}, {transform_indices = @transform_3, window_bounds = array<i64: 8, 128>}]} {
    %c0 = arith.constant 0 : index
    %0 = memref.load %arg1[%c0] : memref<28xf32, #tpu.memory_space<smem>>
    %c1 = arith.constant 1 : index
    %1 = memref.load %arg1[%c1] : memref<28xf32, #tpu.memory_space<smem>>
    %c2 = arith.constant 2 : index
    %2 = memref.load %arg1[%c2] : memref<28xf32, #tpu.memory_space<smem>>
    %c3 = arith.constant 3 : index
    %3 = memref.load %arg1[%c3] : memref<28xf32, #tpu.memory_space<smem>>
    %c4 = arith.constant 4 : index
    %4 = memref.load %arg1[%c4] : memref<28xf32, #tpu.memory_space<smem>>
    %c5 = arith.constant 5 : index
    %5 = memref.load %arg1[%c5] : memref<28xf32, #tpu.memory_space<smem>>
    %c6 = arith.constant 6 : index
    %6 = memref.load %arg1[%c6] : memref<28xf32, #tpu.memory_space<smem>>
    %c7 = arith.constant 7 : index
    %7 = memref.load %arg1[%c7] : memref<28xf32, #tpu.memory_space<smem>>
    %c8 = arith.constant 8 : index
    %8 = memref.load %arg1[%c8] : memref<28xf32, #tpu.memory_space<smem>>
    %c9 = arith.constant 9 : index
    %9 = memref.load %arg1[%c9] : memref<28xf32, #tpu.memory_space<smem>>
    %c10 = arith.constant 10 : index
    %10 = memref.load %arg1[%c10] : memref<28xf32, #tpu.memory_space<smem>>
    %c11 = arith.constant 11 : index
    %11 = memref.load %arg1[%c11] : memref<28xf32, #tpu.memory_space<smem>>
    %c12 = arith.constant 12 : index
    %12 = memref.load %arg1[%c12] : memref<28xf32, #tpu.memory_space<smem>>
    %c13 = arith.constant 13 : index
    %13 = memref.load %arg1[%c13] : memref<28xf32, #tpu.memory_space<smem>>
    %c14 = arith.constant 14 : index
    %14 = memref.load %arg1[%c14] : memref<28xf32, #tpu.memory_space<smem>>
    %c15 = arith.constant 15 : index
    %15 = memref.load %arg1[%c15] : memref<28xf32, #tpu.memory_space<smem>>
    %c16 = arith.constant 16 : index
    %16 = memref.load %arg1[%c16] : memref<28xf32, #tpu.memory_space<smem>>
    %c17 = arith.constant 17 : index
    %17 = memref.load %arg1[%c17] : memref<28xf32, #tpu.memory_space<smem>>
    %c18 = arith.constant 18 : index
    %18 = memref.load %arg1[%c18] : memref<28xf32, #tpu.memory_space<smem>>
    %c19 = arith.constant 19 : index
    %19 = memref.load %arg1[%c19] : memref<28xf32, #tpu.memory_space<smem>>
    %c20 = arith.constant 20 : index
    %20 = memref.load %arg1[%c20] : memref<28xf32, #tpu.memory_space<smem>>
    %c21 = arith.constant 21 : index
    %21 = memref.load %arg1[%c21] : memref<28xf32, #tpu.memory_space<smem>>
    %c22 = arith.constant 22 : index
    %22 = memref.load %arg1[%c22] : memref<28xf32, #tpu.memory_space<smem>>
    %c23 = arith.constant 23 : index
    %23 = memref.load %arg1[%c23] : memref<28xf32, #tpu.memory_space<smem>>
    %c24 = arith.constant 24 : index
    %24 = memref.load %arg1[%c24] : memref<28xf32, #tpu.memory_space<smem>>
    %c25 = arith.constant 25 : index
    %25 = memref.load %arg1[%c25] : memref<28xf32, #tpu.memory_space<smem>>
    %c26 = arith.constant 26 : index
    %26 = memref.load %arg1[%c26] : memref<28xf32, #tpu.memory_space<smem>>
    %c27 = arith.constant 27 : index
    %27 = memref.load %arg1[%c27] : memref<28xf32, #tpu.memory_space<smem>>
    %c0_i32 = arith.constant 0 : i32
    %c1_i32 = arith.constant 1 : i32
    %28 = arith.muli %c0_i32, %c1_i32 : i32
    %c0_i32_0 = arith.constant 0 : i32
    %29 = arith.addi %c0_i32_0, %28 : i32
    %c8_i32 = arith.constant 8 : i32
    %30 = arith.muli %29, %c8_i32 : i32
    %31 = tpu.assume_multiple %30, 8 : i32
    %32 = arith.index_cast %31 : i32 to index
    %c0_1 = arith.constant 0 : index
    %33 = vector.load %arg2[%32, %c0_1] : memref<8x128xf32, #tpu.memory_space<vmem>>, vector<8x128xf32>
    %34 = arith.index_cast %31 : i32 to index
    %c0_2 = arith.constant 0 : index
    %35 = vector.load %arg3[%34, %c0_2] : memref<8x128xf32, #tpu.memory_space<vmem>>, vector<8x128xf32>
    %36 = arith.mulf %33, %33 : vector<8x128xf32>
    %37 = arith.mulf %35, %35 : vector<8x128xf32>
    %38 = vector.broadcast %0 : f32 to vector<8x128xf32>
    %39 = arith.mulf %38, %36 : vector<8x128xf32>
    %40 = vector.broadcast %1 : f32 to vector<8x128xf32>
    %41 = arith.mulf %40, %37 : vector<8x128xf32>
    %42 = arith.addf %39, %41 : vector<8x128xf32>
    %43 = vector.broadcast %6 : f32 to vector<8x128xf32>
    %44 = arith.mulf %43, %33 : vector<8x128xf32>
    %45 = arith.addf %42, %44 : vector<8x128xf32>
    %46 = vector.broadcast %7 : f32 to vector<8x128xf32>
    %47 = arith.mulf %46, %35 : vector<8x128xf32>
    %48 = arith.addf %45, %47 : vector<8x128xf32>
    %49 = vector.broadcast %12 : f32 to vector<8x128xf32>
    %50 = arith.addf %48, %49 : vector<8x128xf32>
    %51 = vector.broadcast %2 : f32 to vector<8x128xf32>
    %52 = arith.mulf %51, %36 : vector<8x128xf32>
    %53 = vector.broadcast %3 : f32 to vector<8x128xf32>
    %54 = arith.mulf %53, %37 : vector<8x128xf32>
    %55 = arith.addf %52, %54 : vector<8x128xf32>
    %56 = vector.broadcast %8 : f32 to vector<8x128xf32>
    %57 = arith.mulf %56, %33 : vector<8x128xf32>
    %58 = arith.addf %55, %57 : vector<8x128xf32>
    %59 = vector.broadcast %9 : f32 to vector<8x128xf32>
    %60 = arith.mulf %59, %35 : vector<8x128xf32>
    %61 = arith.addf %58, %60 : vector<8x128xf32>
    %62 = vector.broadcast %13 : f32 to vector<8x128xf32>
    %63 = arith.addf %61, %62 : vector<8x128xf32>
    %64 = vector.broadcast %4 : f32 to vector<8x128xf32>
    %65 = arith.mulf %64, %36 : vector<8x128xf32>
    %66 = vector.broadcast %5 : f32 to vector<8x128xf32>
    %67 = arith.mulf %66, %37 : vector<8x128xf32>
    %68 = arith.addf %65, %67 : vector<8x128xf32>
    %69 = vector.broadcast %10 : f32 to vector<8x128xf32>
    %70 = arith.mulf %69, %33 : vector<8x128xf32>
    %71 = arith.addf %68, %70 : vector<8x128xf32>
    %72 = vector.broadcast %11 : f32 to vector<8x128xf32>
    %73 = arith.mulf %72, %35 : vector<8x128xf32>
    %74 = arith.addf %71, %73 : vector<8x128xf32>
    %75 = vector.broadcast %14 : f32 to vector<8x128xf32>
    %76 = arith.addf %74, %75 : vector<8x128xf32>
    %77 = arith.maximumf %50, %63 : vector<8x128xf32>
    %78 = arith.maximumf %77, %76 : vector<8x128xf32>
    %79 = arith.subf %50, %78 : vector<8x128xf32>
    %80 = math.exp %79 : vector<8x128xf32>
    %81 = arith.subf %63, %78 : vector<8x128xf32>
    %82 = math.exp %81 : vector<8x128xf32>
    %83 = arith.subf %76, %78 : vector<8x128xf32>
    %84 = math.exp %83 : vector<8x128xf32>
    %85 = arith.addf %80, %82 : vector<8x128xf32>
    %86 = arith.addf %85, %84 : vector<8x128xf32>
    %87 = tpu.reciprocal %86 {approx = true} : vector<8x128xf32> -> vector<8x128xf32>
    %88 = vector.broadcast %15 : f32 to vector<8x128xf32>
    %89 = arith.mulf %88, %33 : vector<8x128xf32>
    %90 = vector.broadcast %16 : f32 to vector<8x128xf32>
    %91 = arith.mulf %90, %35 : vector<8x128xf32>
    %92 = arith.addf %89, %91 : vector<8x128xf32>
    %93 = vector.broadcast %21 : f32 to vector<8x128xf32>
    %94 = arith.addf %92, %93 : vector<8x128xf32>
    %cst = arith.constant 0.000000e+00 : f32
    %95 = vector.broadcast %cst : f32 to vector<8x128xf32>
    %96 = arith.maximumf %94, %95 : vector<8x128xf32>
    %97 = vector.broadcast %17 : f32 to vector<8x128xf32>
    %98 = arith.mulf %97, %33 : vector<8x128xf32>
    %99 = vector.broadcast %18 : f32 to vector<8x128xf32>
    %100 = arith.mulf %99, %35 : vector<8x128xf32>
    %101 = arith.addf %98, %100 : vector<8x128xf32>
    %102 = vector.broadcast %22 : f32 to vector<8x128xf32>
    %103 = arith.addf %101, %102 : vector<8x128xf32>
    %cst_3 = arith.constant 0.000000e+00 : f32
    %104 = vector.broadcast %cst_3 : f32 to vector<8x128xf32>
    %105 = arith.maximumf %103, %104 : vector<8x128xf32>
    %106 = vector.broadcast %19 : f32 to vector<8x128xf32>
    %107 = arith.mulf %106, %33 : vector<8x128xf32>
    %108 = vector.broadcast %20 : f32 to vector<8x128xf32>
    %109 = arith.mulf %108, %35 : vector<8x128xf32>
    %110 = arith.addf %107, %109 : vector<8x128xf32>
    %111 = vector.broadcast %23 : f32 to vector<8x128xf32>
    %112 = arith.addf %110, %111 : vector<8x128xf32>
    %cst_4 = arith.constant 0.000000e+00 : f32
    %113 = vector.broadcast %cst_4 : f32 to vector<8x128xf32>
    %114 = arith.maximumf %112, %113 : vector<8x128xf32>
    %115 = arith.mulf %80, %87 : vector<8x128xf32>
    %116 = arith.addf %96, %115 : vector<8x128xf32>
    %117 = vector.broadcast %24 : f32 to vector<8x128xf32>
    %118 = arith.mulf %117, %116 : vector<8x128xf32>
    %119 = arith.mulf %82, %87 : vector<8x128xf32>
    %120 = arith.addf %105, %119 : vector<8x128xf32>
    %121 = vector.broadcast %25 : f32 to vector<8x128xf32>
    %122 = arith.mulf %121, %120 : vector<8x128xf32>
    %123 = arith.addf %118, %122 : vector<8x128xf32>
    %124 = arith.mulf %84, %87 : vector<8x128xf32>
    %125 = arith.addf %114, %124 : vector<8x128xf32>
    %126 = vector.broadcast %26 : f32 to vector<8x128xf32>
    %127 = arith.mulf %126, %125 : vector<8x128xf32>
    %128 = arith.addf %123, %127 : vector<8x128xf32>
    %129 = vector.broadcast %27 : f32 to vector<8x128xf32>
    %130 = arith.addf %128, %129 : vector<8x128xf32>
    %131 = math.tanh %130 : vector<8x128xf32>
    %cst_5 = arith.constant 5.000000e-01 : f32
    %132 = vector.broadcast %cst_5 : f32 to vector<8x128xf32>
    %133 = arith.mulf %132, %131 : vector<8x128xf32>
    %cst_6 = arith.constant 5.000000e-01 : f32
    %134 = vector.broadcast %cst_6 : f32 to vector<8x128xf32>
    %135 = arith.addf %133, %134 : vector<8x128xf32>
    %136 = arith.index_cast %31 : i32 to index
    %c0_7 = arith.constant 0 : index
    %137 = vector.load %arg4[%136, %c0_7] : memref<8x128xf32, #tpu.memory_space<vmem>>, vector<8x128xf32>
    tpu.vector_store %arg4[%136, %c0_7], %135 {strides = array<i32>} : memref<8x128xf32, #tpu.memory_space<vmem>>, vector<8x128xf32>,
    %c1_i32_8 = arith.constant 1 : i32
    return
  }
  func.func @transform_0(%arg0: i32) -> i32 {
    %c0_i32 = arith.constant 0 : i32
    %c0_i32_0 = arith.constant 0 : i32
    return %c0_i32 : i32
  }
  func.func @transform_1(%arg0: i32) -> (i32, i32) {
    %c0_i32 = arith.constant 0 : i32
    %c0_i32_0 = arith.constant 0 : i32
    return %arg0, %c0_i32 : i32, i32
  }
  func.func @transform_2(%arg0: i32) -> (i32, i32) {
    %c0_i32 = arith.constant 0 : i32
    %c0_i32_0 = arith.constant 0 : i32
    return %arg0, %c0_i32 : i32, i32
  }
  func.func @transform_3(%arg0: i32) -> (i32, i32) {
    %c0_i32 = arith.constant 0 : i32
    %c0_i32_0 = arith.constant 0 : i32
    return %arg0, %c0_i32 : i32, i32
  }
}

</mosaic_0001>

<bundles_post_ra>
// kernel: tpu_custom_call.1
= control target key start
LH: loop header
LB: loop body
LE: loop exit
PB: predicated region body
PF: predicated region fallthrough
CT: control target
= control target key end

     0   :  { %8 = vsyncpa [#allocation5], 0  ;;  %s369_s0 = inlined_call_operand.hbm [shape: f32[28], index: 0, kind: input, shape index: {}]   ;;  %s370_s1 = inlined_call_operand.hbm [shape: f32[8,128], index: 1, kind: input, shape index: {}]   ;;  %s371_s2 = inlined_call_operand.hbm [shape: f32[8,128], index: 2, kind: input, shape index: {}]   ;;  %s372_s3 = inlined_call_operand.hbm [shape: f32[8,128], index: 3, kind: output, shape index: {}]  }
   0x1   :  { %9 = vsyncpa [#allocation3], 0 }
   0x2   :  { %10 = vsyncpa [#allocation8], 0 }
   0x3   :  { %11 = vsyncpa [#allocation4], 0  ;;  %s313_s12 = smov [#allocation2]   ;;  %s314_s15 = smov [#allocation6]  }
   0x4   :  { %19 = dma.hbm_to_smem %s369_s0, 16, %s313_s12, [#allocation5]  }
   0x5   :  { %s26_s16 = sshll.u32 %s314_s15, 4  ;;  %s315_s17 = smov [#allocation7]   ;;  %s27_s16 = int_to_ptr.vmem [resolvable:$true] %s26_s16 }
   0x6   :  { %s36_s18 = sshll.u32 %s315_s17, 4  ;;  %s253_s19 = scalar_lea.vmem %s27_s16, 128  ;;  %s37_s18 = int_to_ptr.vmem [resolvable:$true] %s36_s18 }
   0x7   :  { %p254_p0 = scmp.ne.s32.totalorder %s27_s16, %s253_s19  ;;  %p258_p1 = scmp.lt.s32.totalorder %s27_s16, %s27_s16 }
   0x8   :  { %p259_p2 = scmp.lt.s32.totalorder %s253_s19, %s253_s19 }
   0xa   :  { %p260_p3 = por %p259_p2, %p258_p1 }
   0xc   :  { %p261_p4 = pnand %p260_p3, %p254_p0 }
   0xe   :  { %264 = shalt.err (!%p261_p4)
}
   0xf   :  { %29 = dma.hbm_to_vmem [thread:$0]  %s370_s1, 128, %s27_s16, [#allocation3]  }
  0x10   :  { %s273_s22 = scalar_lea.vmem %s37_s18, 128  ;;  %p278_p6 = scmp.lt.s32.totalorder %s37_s18, %s37_s18 }
  0x11   :  { %p274_p5 = scmp.ne.s32.totalorder %s37_s18, %s273_s22  ;;  %p279_p7 = scmp.lt.s32.totalorder %s273_s22, %s273_s22 }
  0x13   :  { %p280_p8 = por %p279_p7, %p278_p6 }
  0x15   :  { %p281_p9 = pnand %p280_p8, %p274_p5 }
  0x17   :  { %284 = shalt.err (!%p281_p9)
}
  0x18   :  { %39 = dma.hbm_to_vmem [thread:$0]  %s371_s2, 128, %s37_s18, [#allocation8]  }
  0x19   :  { %305 = dma.done.wait [#allocation5], 16  }
  0x1a   :  { %306 = vsyncadd [#allocation5], 4294967280 }
  0x1b   :  { %307 = dma.done.wait [#allocation3], 128  }
  0x1c   :  { %308 = vsyncadd [#allocation3], 4294967168 }
  0x1d   :  { %309 = dma.done.wait [#allocation8], 128  }
  0x1e   :  { %310 = vsyncadd [#allocation8], 4294967168 }
  0x1f   :  { %49 = sfence }
  0x20   :  { %s50_s1 = sld [smem:[#allocation2]]  ;;  %v346_v0 = vld [vmem:[#allocation6] sm:$0xff]  ;;  %v348_v1 = vld [vmem:[#allocation7] sm:$0xff]  ;;  %s316_s0 = smov [#allocation9]  }
  0x21   :  { %s196_s24 = sld [smem:[#allocation2 + $0x1]]  ;;  %v80_v2 = vmul.f32 %v346_v0, %v346_v0  ;;  %v81_v3 = vmul.f32 %v348_v1, %v348_v1  ;;  %s185_s23 = sshll.u32 %s316_s0, 4  ;;  %s186_s23 = int_to_ptr.vmem [resolvable:$true] %s185_s23 }
  0x22   :  { %s197_s25 = sld [smem:[#allocation2 + $0x2]]  ;;  %p290_p11 = scmp.lt.s32.totalorder %s186_s23, %s186_s23 }
  0x23   :  { %s198_s26 = sld [smem:[#allocation2 + $0x3]] }
  0x24   :  { %s199_s27 = sld [smem:[#allocation2 + $0x4]] }
  0x25   :  { %s200_s2 = sld [smem:[#allocation2 + $0x5]] }
  0x26   :  { %s201_s28 = sld [smem:[#allocation2 + $0x6]]  ;;  %v82_v4 = vstv %s50_s1  ;;  %s285_s1 = scalar_lea.vmem %s186_s23, 128 }
  0x27   :  { %s202_s29 = sld [smem:[#allocation2 + $0x7]]  ;;  %v83_v5 = vmul.f32 %v82_v4, %v80_v2  ;;  %v84_v6 = vstv %s196_s24  ;;  %p286_p10 = scmp.ne.s32.totalorder %s186_s23, %s285_s1 }
  0x28   :  { %s203_s30 = sld [smem:[#allocation2 + $0x8]]  ;;  %v85_v7 = vmul.f32 %v84_v6, %v81_v3  ;;  %v95_v8 = vstv %s197_s25  ;;  %p291_p12 = scmp.lt.s32.totalorder %s285_s1, %s285_s1 }
  0x29   :  { %s204_s4 = sld [smem:[#allocation2 + $0x9]]  ;;  %v96_v9 = vmul.f32 %v95_v8, %v80_v2  ;;  %v97_v10 = vstv %s198_s26 }
  0x2a   :  { %s205_s5 = sld [smem:[#allocation2 + $0xa]]  ;;  %v98_v11 = vmul.f32 %v97_v10, %v81_v3  ;;  %v108_v12 = vstv %s199_s27  ;;  %v86_v13 = vadd.f32 %v85_v7, %v83_v5  ;;  %p292_p13 = por %p291_p12, %p290_p11 }
  0x2b   :  { %s206_s6 = sld [smem:[#allocation2 + $0xb]]  ;;  %v109_v14 = vmul.f32 %v108_v12, %v80_v2  ;;  %v110_v15 = vstv %s200_s2 }
  0x2c   :  { %s207_s7 = sld [smem:[#allocation2 + $0xc]]  ;;  %v87_v16 = vstv %s201_s28  ;;  %v111_v17 = vmul.f32 %v110_v15, %v81_v3  ;;  %v99_v20 = vadd.f32 %v98_v11, %v96_v9  ;;  %p293_p0 = pnand %p292_p13, %p286_p10 }
  0x2d   :  { %s208_s8 = sld [smem:[#allocation2 + $0xd]]  ;;  %v88_v18 = vmul.f32 %v87_v16, %v346_v0  ;;  %v90_v19 = vstv %s202_s29 }
  0x2e   :  { %s209_s9 = sld [smem:[#allocation2 + $0xe]]  ;;  %v91_v21 = vmul.f32 %v90_v19, %v348_v1  ;;  %v100_v22 = vstv %s203_s30  ;;  %v112_v26 = vadd.f32 %v111_v17, %v109_v14 }
  0x2f   :  { %v89_v23 = vadd.f32 %v88_v18, %v86_v13  ;;  %v101_v24 = vmul.f32 %v100_v22, %v346_v0  ;;  %v103_v25 = vstv %s204_s4  ;;  %s210_s10 = sld [smem:[#allocation2 + $0xf]] }
  0x30   :  { %v104_v27 = vmul.f32 %v103_v25, %v348_v1  ;;  %v113_v28 = vstv %s205_s5  ;;  %s211_s11 = sld [smem:[#allocation2 + $0x10]] }
  0x31   :  { %v92_v29 = vadd.f32 %v91_v21, %v89_v23  ;;  %v102_v30 = vadd.f32 %v101_v24, %v99_v20  ;;  %v114_v31 = vmul.f32 %v113_v28, %v346_v0  ;;  %v116_v32 = vstv %s206_s6  ;;  %s212_s12 = sld [smem:[#allocation2 + $0x11]] }
  0x32   :  { %v93_v33 = vstv %s207_s7  ;;  %v117_v34 = vmul.f32 %v116_v32, %v348_v1  ;;  %s213_s13 = sld [smem:[#allocation2 + $0x12]] }
  0x33   :  { %v94_v35 = vadd.f32 %v93_v33, %v92_v29  ;;  %v105_v36 = vadd.f32 %v104_v27, %v102_v30  ;;  %v106_v37 = vstv %s208_s8  ;;  %v115_v38 = vadd.f32 %v114_v31, %v112_v26  ;;  %s214_s14 = sld [smem:[#allocation2 + $0x13]] }
  0x34   :  { %v119_v39 = vstv %s209_s9  ;;  %s215_s15 = sld [smem:[#allocation2 + $0x14]] }
  0x35   :  { %v107_v40 = vadd.f32 %v106_v37, %v105_v36  ;;  %v118_v41 = vadd.f32 %v117_v34, %v115_v38  ;;  %s216_s16 = sld [smem:[#allocation2 + $0x15]]  ;;  %v135_v55 = vstv %s210_s10 }
  0x36   :  { %s217_s17 = sld [smem:[#allocation2 + $0x16]]  ;;  %v137_v56 = vstv %s211_s11  ;;  %v136_v62 = vmul.f32 %v135_v55, %v346_v0 }
  0x37   :  { %v120_v42 = vadd.f32 %v119_v39, %v118_v41  ;;  %v121_v43 = vmax.f32 %v94_v35, %v107_v40  ;;  %v143_v57 = vstv %s212_s12  ;;  %s218_s18 = sld [smem:[#allocation2 + $0x17]]  ;;  %v138_v63 = vmul.f32 %v137_v56, %v348_v1 }
  0x38   :  { %v145_v58 = vstv %s213_s13  ;;  %v144_v2 = vmul.f32 %v143_v57, %v346_v0  ;;  %s219_s19 = sld [smem:[#allocation2 + $0x18]] }
  0x39   :  { %v122_v44 = vmax.f32 %v121_v43, %v120_v42  ;;  %v151_v59 = vstv %s214_s14  ;;  %v146_v3 = vmul.f32 %v145_v58, %v348_v1  ;;  %v139_v6 = vadd.f32 %v138_v63, %v136_v62  ;;  %s220_s20 = sld [smem:[#allocation2 + $0x19]] }
  0x3a   :  { %v153_v60 = vstv %s215_s15  ;;  %v152_v4 = vmul.f32 %v151_v59, %v346_v0  ;;  %s221_s21 = sld [smem:[#allocation2 + $0x1a]] }
  0x3b   :  { %v123_v45 = vsub.f32 %v94_v35, %v122_v44  ;;  %v126_v46 = vsub.f32 %v107_v40, %v122_v44  ;;  %v129_v47 = vsub.f32 %v120_v42, %v122_v44  ;;  %v154_v5 = vmul.f32 %v153_v60, %v348_v1  ;;  %s222_s22 = sld [smem:[#allocation2 + $0x1b]] }
  0x3c   :  { %v147_v7 = vadd.f32 %v146_v3, %v144_v2  ;;  %v140_v9 = vstv %s216_s16  ;;  %v148_v10 = vstv %s217_s17 }
  0x3d   :  { %v124_v48 = vmul.f32 1.442695, %v123_v45  ;;  %v127_v49 = vmul.f32 1.442695, %v126_v46  ;;  %v130_v50 = vmul.f32 1.442695, %v129_v47  ;;  %v155_v8 = vadd.f32 %v154_v5, %v152_v4 }
  0x3e   :  { %v156_v11 = vstv %s218_s18  ;;  %v141_v12 = vadd.f32 %v140_v9, %v139_v6  ;;  %v149_v13 = vadd.f32 %v148_v10, %v147_v7  ;;  %v161_v20 = vstv %s219_s19 }
  0x3f   :  { %227 = vpow2.f32 %v124_v48  ;;  %v157_v14 = vadd.f32 %v156_v11, %v155_v8  ;;  %v165_v21 = vstv %s220_s20 }
  0x40   :  { %229 = vpow2.f32 %v127_v49  ;;  %v142_v15 = vmax.f32 %v141_v12, 0.0  ;;  %v150_v16 = vmax.f32 %v149_v13, 0.0  ;;  %v170_v22 = vstv %s221_s21 }
  0x41   :  { %231 = vpow2.f32 %v130_v50  ;;  %v158_v17 = vmax.f32 %v157_v14, 0.0  ;;  %v173_v30 = vstv %s222_s22 }
  0x4c   :  { %v228_v51 = vpop.eup %227 }
  0x4d   :  { %v230_v52 = vpop.eup %229 }
  0x4e   :  { %v232_v53 = vpop.eup %231  ;;  %v132_v54 = vadd.f32 %v230_v52, %v228_v51 }
  0x50   :  { %v133_v61 = vadd.f32 %v232_v53, %v132_v54 }
  0x52   :  { %233 = vrcp.f32 %v133_v61 }
  0x5f   :  { %v234_v18 = vpop.eup %233 }
  0x60   :  { %v159_v0 = vmul.f32 %v234_v18, %v228_v51  ;;  %v163_v19 = vmul.f32 %v234_v18, %v230_v52  ;;  %v168_v1 = vmul.f32 %v234_v18, %v232_v53 }
  0x62   :  { %v160_v23 = vadd.f32 %v159_v0, %v142_v15  ;;  %v164_v24 = vadd.f32 %v163_v19, %v150_v16  ;;  %v169_v25 = vadd.f32 %v168_v1, %v158_v17 }
  0x64   :  { %v162_v26 = vmul.f32 %v161_v20, %v160_v23  ;;  %v166_v27 = vmul.f32 %v165_v21, %v164_v24  ;;  %v171_v28 = vmul.f32 %v170_v22, %v169_v25 }
  0x66   :  { %v167_v29 = vadd.f32 %v166_v27, %v162_v26 }
  0x68   :  { %v172_v31 = vadd.f32 %v171_v28, %v167_v29 }
  0x6a   :  { %v174_v32 = vadd.f32 %v173_v30, %v172_v31 }
  0x6c   :  { %235 = vtanh.f32 %v174_v32 }
  0x79   :  { %v236_v33 = vpop.eup %235 }
  0x7a   :  { %v176_v34 = vmul.f32 0.5, %v236_v33 }
  0x7c   :  { %v177_v35 = vadd.f32 0.5, %v176_v34 }
  0x7e   :  { %178 = vst [vmem:[#allocation9] sm:$0xff] %v177_v35 }
  0x7f   :  { %296 = shalt.err (!%p293_p0)
}
  0x80   :  { %188 = dma.vmem_to_hbm [thread:$0]  %s186_s23, 128, %s372_s3, [#allocation4]  }
  0x81   :  { %311 = dma.done.wait [#allocation4], 128  }
  0x82   :  { %312 = vsyncadd [#allocation4], 4294967168 }
  0x83   :  { %192 = vsyncpa [#allocation3], 1 }
  0x84   :  { %193 = vsyncpa [#allocation8], 1 }
  0x85   :  { %194 = vsyncpa [#allocation4], 1 }
  0x86   :  { %195 = vsyncpa [#allocation5], 1 }

</bundles_post_ra>
